<compile_context>
chip_gen: v5e
topology: v5e:2x2
jax: 0.10.0
libtpu: 0.0.40
codegen_flags: <defaults>
</compile_context>

<pallas_src>
import functools

import jax
import jax.numpy as jnp
from jax import lax
from jax.experimental import pallas as pl
from jax.experimental.pallas import tpu as pltpu


# ----------------------------------------------------------------------------
# Per-generation VMEM limit and tile defaults
# ----------------------------------------------------------------------------
def _tpu_vmem_capacity_bytes():
    try:
        return int(pltpu.get_tpu_info().vmem_capacity_bytes)
    except Exception:
        return 64 * 1024 * 1024  # conservative fallback (v7x physical VMEM)


_VMEM_CAP = _tpu_vmem_capacity_bytes()
# Leave ~25% headroom for compiler-internal scratch; never ask for more than ~100 MiB.
_VMEM_LIMIT_BYTES = int(min(_VMEM_CAP * 3 // 4, 100 * 1024 * 1024))
_DEFAULT_ROW_TILE = 512


def _flash_tile_defaults(dtype):
    """(q_tile, k_tile) defaults: big tiles on 128-MiB-VMEM chips (v5e/v6e); conservative on
    v7x (64 MiB) when activations are 4-byte."""
    if _VMEM_CAP < 96 * 1024 * 1024 and jnp.dtype(dtype).itemsize >= 4:
        return 256, 512
    return 512, 1024


def _pick_tile(n, preferred):
    """Largest multiple-of-8 divisor of n that is <= preferred.

    Falls back to the full dimension when n is not a multiple of 8 (the only other legal block
    per the (8,128) rule without a padded/masked last block).
    TODO(synk): support pl.cdiv grids with a masked last block for awkward sequence lengths.
    """
    if n <= preferred:
        return n
    for t in range(preferred, 7, -1):
        if n % t == 0 and t % 8 == 0:
            return t
    return n


# ----------------------------------------------------------------------------
# Projection kernels (row-tiled, weights resident across the grid)
# ----------------------------------------------------------------------------
def _q_proj_kernel(x_ref, w_ref, o_ref, *, scale):
    acc = jnp.dot(x_ref[...], w_ref[...], preferred_element_type=jnp.float32)
    o_ref[...] = (acc * scale).astype(o_ref.dtype)  # fold 1/sqrt(d) into q (O(N*H*D))


def _kv_proj_kernel(c_ref, wk_ref, wv_ref, k_ref, v_ref):
    c = c_ref[...]
    k_ref[...] = jnp.dot(c, wk_ref[...], preferred_element_type=jnp.float32).astype(k_ref.dtype)
    v_ref[...] = jnp.dot(c, wv_ref[...], preferred_element_type=jnp.float32).astype(v_ref.dtype)


def _row_compiler_params():
    return pltpu.CompilerParams(
        dimension_semantics=("parallel",),
        vmem_limit_bytes=_VMEM_LIMIT_BYTES,
    )


def pallas_q_proj(x2d, w, scale, row_tile=None):
    R, K = x2d.shape
    N = w.shape[1]
    TR = _pick_tile(R, row_tile or _DEFAULT_ROW_TILE)
    return pl.pallas_call(
        functools.partial(_q_proj_kernel, scale=scale),
        out_shape=jax.ShapeDtypeStruct((R, N), x2d.dtype),
        grid_spec=pltpu.PrefetchScalarGridSpec(
            num_scalar_prefetch=0,
            grid=(R // TR,),
            in_specs=[
                pl.BlockSpec((TR, K), lambda i: (i, 0)),
                pl.BlockSpec((K, N), lambda i: (0, 0)),   # weight resident across grid
            ],
            out_specs=pl.BlockSpec((TR, N), lambda i: (i, 0)),
        ),
        compiler_params=_row_compiler_params(),
    )(x2d, w)


def pallas_kv_proj(c2d, wk, wv, row_tile=None):
    """Fused K/V projection: context rows read from HBM once, two outputs."""
    R, K = c2d.shape
    N = wk.shape[1]
    TR = _pick_tile(R, row_tile or _DEFAULT_ROW_TILE)
    return pl.pallas_call(
        _kv_proj_kernel,
        out_shape=(
            jax.ShapeDtypeStruct((R, N), c2d.dtype),
            jax.ShapeDtypeStruct((R, N), c2d.dtype),
        ),
        grid_spec=pltpu.PrefetchScalarGridSpec(
            num_scalar_prefetch=0,
            grid=(R // TR,),
            in_specs=[
                pl.BlockSpec((TR, K), lambda i: (i, 0)),
                pl.BlockSpec((K, N), lambda i: (0, 0)),
                pl.BlockSpec((K, N), lambda i: (0, 0)),
            ],
            out_specs=(
                pl.BlockSpec((TR, N), lambda i: (i, 0)),
                pl.BlockSpec((TR, N), lambda i: (i, 0)),
            ),
        ),
        compiler_params=_row_compiler_params(),
    )(c2d, wk, wv)


# ----------------------------------------------------------------------------
# Flash multi-head attention + fused output projection
# (lane-dense (B, S, H*D) layout, online softmax, out-proj in the finalize block)
# ----------------------------------------------------------------------------
def _flash_mha_outproj_kernel(q_ref, k_ref, v_ref, wo_ref, bo_ref, o_ref,
                              m_ref, l_ref, acc_ref, *, heads, dim_head):
    # q_ref: (TQ, H*D)  k_ref/v_ref: (TK, H*D)  wo_ref: (H*D, QD)  bo_ref: (1, QD)
    # o_ref: (TQ, QD)   scratch: m_ref/l_ref (H, TQ, 1) f32, acc_ref (H, TQ, D) f32
    ik = pl.program_id(2)
    nk = pl.num_programs(2)

    @pl.when(ik == 0)
    def _():
        m_ref[...] = jnp.full(m_ref.shape, -jnp.inf, jnp.float32)
        l_ref[...] = jnp.zeros(l_ref.shape, jnp.float32)
        acc_ref[...] = jnp.zeros(acc_ref.shape, jnp.float32)

    q = q_ref[...]   # q already carries the 1/sqrt(d) scale (folded into the Q projection)
    k = k_ref[...]
    v = v_ref[...]

    # Static (unrolled) head loop: static lane slices of VMEM-resident tiles.
    for h in range(heads):
        lo = h * dim_head
        hi = lo + dim_head
        q_h = q[:, lo:hi]                       # (TQ, D)
        k_h = k[:, lo:hi]                       # (TK, D)
        v_h = v[:, lo:hi]                       # (TK, D)

        # scores: contract last axes directly (no k.T / XLU transpose), f32 accumulate on MXU.
        s = lax.dot_general(q_h, k_h, (((1,), (1,)), ((), ())),
                            preferred_element_type=jnp.float32)   # (TQ, TK)

        m_prev = m_ref[h]                                          # (TQ, 1)
        m_new = jnp.maximum(m_prev, jnp.max(s, axis=-1, keepdims=True))
        alpha = jnp.exp(m_prev - m_new)
        p = jnp.exp(s - m_new)                                     # (TQ, TK) f32
        l_ref[h] = alpha * l_ref[h] + jnp.sum(p, axis=-1, keepdims=True)
        acc_ref[h] = alpha * acc_ref[h] + jnp.dot(
            p.astype(v_h.dtype), v_h, preferred_element_type=jnp.float32)
        m_ref[h] = m_new

    @pl.when(ik == nk - 1)
    def _():
        # Finalize: normalize per head (EUP reciprocal; ~1e-3 rel err on the denominator,
        # acceptable for inference), concatenate into one lane-dense (TQ, H*D) slab, and apply
        # the fused output projection — single full-width store, no HBM round trip.
        attn = jnp.concatenate(
            [acc_ref[h] * pl.reciprocal(l_ref[h], approx=True) for h in range(heads)],
            axis=-1).astype(wo_ref.dtype)                          # (TQ, H*D)
        out = jnp.dot(attn, wo_ref[...], preferred_element_type=jnp.float32)
        o_ref[...] = (out + bo_ref[...].astype(jnp.float32)).astype(o_ref.dtype)


def pallas_flash_mha_outproj(q, k, v, w_o, b_o, heads, dim_head, *,
                             q_tile=None, k_tile=None):
    """q: (B, N, H*D), k/v: (B, M, H*D), w_o: (H*D, QD), b_o: (1, QD) -> (B, N, QD).
    The 1/sqrt(dim_head) scale must already be folded into q."""
    B, N, HD = q.shape
    M = k.shape[1]
    QD = w_o.shape[1]

    dq, dk = _flash_tile_defaults(q.dtype)
    TQ = _pick_tile(N, q_tile if q_tile is not None else dq)
    TK = _pick_tile(M, k_tile if k_tile is not None else dk)

    # Megacore (v7x has 2 TCs): make sure the parallel axes (B, N//TQ) expose >= 2 blocks.
    if B * (N // TQ) < 2:
        half = (N // 2) // 8 * 8
        if half >= 8:
            TQ = _pick_tile(N, half)

    kernel = functools.partial(_flash_mha_outproj_kernel, heads=heads, dim_head=dim_head)
    return pl.pallas_call(
        kernel,
        out_shape=jax.ShapeDtypeStruct((B, N, QD), q.dtype),
        grid_spec=pltpu.PrefetchScalarGridSpec(
            num_scalar_prefetch=0,
            grid=(B, N // TQ, M // TK),
            in_specs=[
                pl.BlockSpec((pl.Squeezed(), TQ, HD), lambda b, iq, ik: (b, iq, 0)),
                pl.BlockSpec((pl.Squeezed(), TK, HD), lambda b, iq, ik: (b, ik, 0)),
                pl.BlockSpec((pl.Squeezed(), TK, HD), lambda b, iq, ik: (b, ik, 0)),
                # Constant-index resident weights for the fused output projection.
                pl.BlockSpec((HD, QD), lambda b, iq, ik: (0, 0)),
                pl.BlockSpec((1, QD), lambda b, iq, ik: (0, 0)),
            ],
            out_specs=pl.BlockSpec((pl.Squeezed(), TQ, QD), lambda b, iq, ik: (b, iq, 0)),
            scratch_shapes=[
                pltpu.VMEM((heads, TQ, 1), jnp.float32),         # running max
                pltpu.VMEM((heads, TQ, 1), jnp.float32),         # running denom
                pltpu.VMEM((heads, TQ, dim_head), jnp.float32),  # running output accumulator
            ],
        ),
        compiler_params=pltpu.CompilerParams(
            dimension_semantics=("parallel", "parallel", "arbitrary"),
            vmem_limit_bytes=_VMEM_LIMIT_BYTES,
        ),
    )(q, k, v, w_o, b_o)


# ----------------------------------------------------------------------------
# Module (parameters + forward glue)
# ----------------------------------------------------------------------------
class MemoryEfficientCrossAttention:
    def __init__(self, query_dim, context_dim=None, heads=8, dim_head=64,
                 dropout=0.0, key=None, q_block=None, k_block=None, row_block=None):
        inner_dim = dim_head * heads
        context_dim = query_dim if context_dim is None else context_dim
        self.heads = heads
        self.dim_head = dim_head
        self.query_dim = query_dim
        self.context_dim = context_dim
        self.inner_dim = inner_dim
        self.q_block = q_block
        self.k_block = k_block
        self.row_block = row_block
        # TODO(synk): training-mode dropout (p>0) has no equivalent here; treated as identity (eval).

        if key is None:
            key = jax.random.PRNGKey(0)
        k1, k2, k3, k4, k5 = jax.random.split(key, 5)
        # Deterministic synthetic init; f32 master weights stored transposed for x @ W.
        std_q = 1.0 / jnp.sqrt(query_dim)
        std_c = 1.0 / jnp.sqrt(context_dim)
        std_o = 1.0 / jnp.sqrt(inner_dim)
        self.w_q = jax.random.normal(k1, (query_dim, inner_dim), jnp.float32) * std_q
        self.w_k = jax.random.normal(k2, (context_dim, inner_dim), jnp.float32) * std_c
        self.w_v = jax.random.normal(k3, (context_dim, inner_dim), jnp.float32) * std_c
        self.w_o = jax.random.normal(k4, (inner_dim, query_dim), jnp.float32) * std_o
        self.b_o = jax.random.normal(k5, (query_dim,), jnp.float32) * std_o

    def __call__(self, x, context=None, mask=None):
        if mask is not None:
            raise NotImplementedError  # matches the original module
        b, n, _ = x.shape
        context = x if context is None else context
        m = context.shape[1]
        h, d, hd = self.heads, self.dim_head, self.inner_dim
        scale = 1.0 / (d ** 0.5)  # xformers memory_efficient_attention default scale

        # Cast weights to the activation dtype so bf16 activations run the bf16 MXU path
        # end-to-end (all kernels accumulate in f32 via preferred_element_type).
        dtype = x.dtype
        w_q = self.w_q.astype(dtype)
        w_k = self.w_k.astype(dtype)
        w_v = self.w_v.astype(dtype)
        w_o = self.w_o.astype(dtype)
        b_o = self.b_o.astype(dtype).reshape(1, self.query_dim)

        # Projections (row-tiled Pallas kernels); scale folded into q; K/V fused.
        q = pallas_q_proj(x.reshape(b * n, self.query_dim), w_q, scale,
                          row_tile=self.row_block)
        k, v = pallas_kv_proj(context.astype(dtype).reshape(b * m, self.context_dim),
                              w_k, w_v, row_tile=self.row_block)

        # Lane-dense (B, S, H*D) layout — plain reshapes only, no transposes.
        q = q.reshape(b, n, hd)
        k = k.reshape(b, m, hd)
        v = v.reshape(b, m, hd)

        # Flash attention with the output projection (+ bias) fused into the finalize step.
        # Dropout in to_out is identity at inference.
        return pallas_flash_mha_outproj(q, k, v, w_o, b_o, h, d,
                                        q_tile=self.q_block, k_tile=self.k_block)


# ----------------------------------------------------------------------------
# Reference (pure JAX) for verification
# ----------------------------------------------------------------------------
def reference_forward(mod, x, context=None):
    context = x if context is None else context
    b, n, _ = x.shape
    m = context.shape[1]
    h, d = mod.heads, mod.dim_head
    q = x @ mod.w_q
    k = context @ mod.w_k
    v = context @ mod.w_v
    q = q.reshape(b, n, h, d).transpose(0, 2, 1, 3)
    k = k.reshape(b, m, h, d).transpose(0, 2, 1, 3)
    v = v.reshape(b, m, h, d).transpose(0, 2, 1, 3)
    s = jnp.einsum("bhnd,bhmd->bhnm", q, k) / (d ** 0.5)
    p = jax.nn.softmax(s, axis=-1)
    o = jnp.einsum("bhnm,bhmd->bhnd", p, v)
    o = o.transpose(0, 2, 1, 3).reshape(b, n, h * d)
    return o @ mod.w_o + mod.b_o


# ----------------------------------------------------------------------------
if __name__ == "__main__":
    key = jax.random.PRNGKey(0)
    k_x, k_ctx, k_params = jax.random.split(key, 3)

    # Small shapes: batch=2, seq=16, query_dim=32, context seq=8, context_dim=32
    B, N, QD = 2, 16, 32
    M, CD = 8, 32
    heads, dim_head = 4, 16

    x = jax.random.normal(k_x, (B, N, QD), jnp.float32)
    ctx = jax.random.normal(k_ctx, (B, M, CD), jnp.float32)

    # Small q/k blocks so the demo exercises the multi-step online softmax accumulation.
    mod = MemoryEfficientCrossAttention(
        query_dim=QD, context_dim=CD, heads=heads, dim_head=dim_head,
        key=k_params, q_block=8, k_block=8,
    )

    # Cross-attention path (context given)
    out = jax.block_until_ready(mod(x, context=ctx))
    ref = reference_forward(mod, x, context=ctx)
    assert out.shape == (B, N, QD)
    assert jnp.allclose(out, ref, atol=2e-2, rtol=2e-2), "mismatch vs reference (cross)"

    # Self-attention path (context=None): N=M=16 -> 2 Nk blocks, tests running m/l/acc.
    out_self = jax.block_until_ready(mod(x))
    ref_self = reference_forward(mod, x)
    assert jnp.allclose(out_self, ref_self, atol=2e-2, rtol=2e-2), "mismatch vs reference (self)"

    # bf16 end-to-end smoke test (weights cast to activation dtype; f32 accumulation inside).
    # Same parameters (same PRNG key); default tiles -> full-dim blocks at these tiny shapes.
    mod_bf16 = MemoryEfficientCrossAttention(
        query_dim=QD, context_dim=CD, heads=heads, dim_head=dim_head, key=k_params,
    )
    out_bf16 = jax.block_until_ready(
        mod_bf16(x.astype(jnp.bfloat16), context=ctx.astype(jnp.bfloat16)))
    assert out_bf16.shape == (B, N, QD) and out_bf16.dtype == jnp.bfloat16
    assert bool(jnp.all(jnp.isfinite(out_bf16.astype(jnp.float32))))
    assert jnp.allclose(out_bf16.astype(jnp.float32), ref, atol=1e-1, rtol=1e-1), \
        "mismatch vs reference (bf16)"

    print("KERNEL_OK")
</pallas_src>

<mosaic_0001>
module attributes {stable_mosaic.version = 11 : i64} {
  func.func @_q_proj_kernel(%arg0: i32, %arg1: memref<32x32xf32, #tpu.memory_space<vmem>>, %arg2: memref<32x64xf32, #tpu.memory_space<vmem>>, %arg3: memref<32x64xf32, #tpu.memory_space<vmem>>) attributes {dimension_semantics = [#tpu.dimension_semantics<parallel>], iteration_bounds = array<i64: 1>, scalar_prefetch = 0 : i64, scratch_operands = 0 : i64, tpu.core_type = #tpu.core_type<tc>, window_params = [{transform_indices = @transform_0, window_bounds = array<i64: 32, 32>}, {pipeline_mode = #tpu.pipeline_mode<synchronous>, transform_indices = @transform_1, window_bounds = array<i64: 32, 64>}, {transform_indices = @transform_2, window_bounds = array<i64: 32, 64>}]} {
    %c0 = arith.constant 0 : index
    %c0_0 = arith.constant 0 : index
    %0 = vector.load %arg1[%c0, %c0_0] : memref<32x32xf32, #tpu.memory_space<vmem>>, vector<32x32xf32>
    %c0_1 = arith.constant 0 : index
    %c0_2 = arith.constant 0 : index
    %1 = vector.load %arg2[%c0_1, %c0_2] : memref<32x64xf32, #tpu.memory_space<vmem>>, vector<32x64xf32>
    %cst = arith.constant dense<0.000000e+00> : vector<32x64xf32>
    %2 = tpu.matmul %0, %1, %cst {dimension_numbers = #tpu.dot_dimension_numbers<[1], [0], [0], [1], [0, 0, 1, 1], [], []>} : vector<32x32xf32>, vector<32x64xf32>, vector<32x64xf32> -> vector<32x64xf32>
    %cst_3 = arith.constant 2.500000e-01 : f32
    %3 = vector.broadcast %cst_3 : f32 to vector<32x64xf32>
    %4 = arith.mulf %2, %3 : vector<32x64xf32>
    %c0_4 = arith.constant 0 : index
    %c0_5 = arith.constant 0 : index
    %5 = vector.load %arg3[%c0_4, %c0_5] : memref<32x64xf32, #tpu.memory_space<vmem>>, vector<32x64xf32>
    tpu.vector_store %arg3[%c0_4, %c0_5], %4 {strides = array<i32>} : memref<32x64xf32, #tpu.memory_space<vmem>>, vector<32x64xf32>,
    return
  }
  func.func @transform_0(%arg0: i32) -> (i32, i32) {
    %c0_i32 = arith.constant 0 : i32
    %c0_i32_0 = arith.constant 0 : i32
    return %arg0, %c0_i32 : i32, i32
  }
  func.func @transform_1(%arg0: i32) -> (i32, i32) {
    %c0_i32 = arith.constant 0 : i32
    %c0_i32_0 = arith.constant 0 : i32
    %c0_i32_1 = arith.constant 0 : i32
    return %c0_i32, %c0_i32_0 : i32, i32
  }
  func.func @transform_2(%arg0: i32) -> (i32, i32) {
    %c0_i32 = arith.constant 0 : i32
    %c0_i32_0 = arith.constant 0 : i32
    return %arg0, %c0_i32 : i32, i32
  }
}

</mosaic_0001>

<bundles_post_ra>
// kernel: tpu_custom_call.1
= control target key start
LH: loop header
LB: loop body
LE: loop exit
PB: predicated region body
PF: predicated region fallthrough
CT: control target
= control target key end

     0   :  { %7 = vsyncpa [#allocation3], 0  ;;  %s264_s0 = inlined_call_operand.hbm [shape: f32[32,32], index: 0, kind: input, shape index: {}]   ;;  %s265_s1 = inlined_call_operand.hbm [shape: f32[32,64], index: 1, kind: input, shape index: {}]   ;;  %s266_s2 = inlined_call_operand.hbm [shape: f32[32,64], index: 2, kind: output, shape index: {}]  }
   0x1   :  { %8 = vsyncpa [#allocation6], 0 }
   0x2   :  { %9 = vsyncpa [#allocation4], 0  ;;  %s14_s11 = sshll.u32 %s264_s0, 4  ;;  %s222_s12 = smov [#allocation2]   ;;  %s15_s11 = int_to_ptr.hbm [resolvable:$true] %s14_s11 }
   0x3   :  { %s16_s13 = sshll.u32 %s222_s12, 4  ;;  %s27_s16 = sshll.u32 %s265_s1, 4  ;;  %s17_s13 = int_to_ptr.vmem [resolvable:$true] %s16_s13  ;;  %s28_s16 = int_to_ptr.hbm [resolvable:$true] %s27_s16 }
   0x4   :  { %s223_s17 = smov 128   ;;  %s224_s18 = smov 8  }
   0x5   :  { %22 = dma.hbm_to_vmem [thread:$0]  %s15_s11, 512, %s17_s13, [#allocation3], %s223_s17, %s223_s17, %s224_s18  }
   0x6   :  { %s225_s19 = smov [#allocation5]  }
   0x7   :  { %s29_s20 = sshll.u32 %s225_s19, 4  ;;  %s30_s20 = int_to_ptr.vmem [resolvable:$true] %s29_s20 }
   0x8   :  { %35 = dma.hbm_to_vmem [thread:$0]  %s28_s16, 512, %s30_s20, [#allocation6], %s223_s17, %s223_s17, %s224_s18  }
   0x9   :  { %216 = dma.done.wait [#allocation3], 512  }
   0xa   :  { %217 = vsyncadd [#allocation3], 4294966784 }
   0xb   :  { %218 = dma.done.wait [#allocation6], 512  }
   0xc   :  { %219 = vsyncadd [#allocation6], 4294966784  ;;  %v51_v0 = vld [vmem:[#allocation5 + $0x18] sm:$0xff]  ;;  %v50_v1 = vld [vmem:[#allocation5 + $0x10] sm:$0xff]  ;;  %vm52_vm0 = vcmask 261120   ;;  %vm98_vm1 = vcmask 523264  }
   0xd   :  { %128 = vmatpush.msra.mxu2 %v51_v0  ;;  %129 = vmatpush.msra.mxu3 %v51_v0  ;;  %v49_v2 = vld [vmem:[#allocation5 + $0x8] sm:$0xff]  ;;  %v48_v3 = vld [vmem:[#allocation5] sm:$0xff]  ;;  %v46_v4 = vld [vmem:[#allocation2 + $0x10] sm:$0xff]  ;;  %s226_s0 = smov [#allocation7]   ;;  %s109_s23 = sshll.u32 %s266_s2, 4  ;;  %s110_s23 = int_to_ptr.hbm [resolvable:$true] %s109_s23 }
   0xe   :  { %77 = vmatpush.msra.mxu0 %v51_v0  ;;  %127 = vmatpush.msra.mxu1 %v51_v0  ;;  %v47_v5 = vld [vmem:[#allocation2 + $0x18] sm:$0xff]  ;;  %v44_v6 = vld [vmem:[#allocation2] sm:$0xff]  ;;  %v45_v7 = vld [vmem:[#allocation2 + $0x8] sm:$0xff]  ;;  %s107_s1 = sshll.u32 %s226_s0, 4  ;;  %s108_s1 = int_to_ptr.vmem [resolvable:$true] %s107_s1 }
   0xf   :  { %131 = vmatpush.msra.mxu2 %v50_v1  ;;  %132 = vmatpush.msra.mxu3 %v50_v1 }
  0x10   :  { %78 = vmatpush.msra.mxu0 %v50_v1  ;;  %130 = vmatpush.msra.mxu1 %v50_v1 }
  0x11   :  { %134 = vmatpush.msra.mxu2 %v49_v2  ;;  %135 = vmatpush.msra.mxu3 %v49_v2 }
  0x12   :  { %79 = vmatpush.msra.mxu0 %v49_v2  ;;  %133 = vmatpush.msra.mxu1 %v49_v2 }
  0x13   :  { %137 = vmatpush.msra.mxu2 %v48_v3  ;;  %138 = vmatpush.msra.mxu3 %v48_v3 }
  0x14   :  { %125 = vmatmul.msk.f32.vlgmr.msra.gmra.mxu2 %vm52_vm0, %v46_v4  ;;  %126 = vmatmul.msk.f32.vlgmr.msra.gmra.mxu3 %vm52_vm0, %v47_v5 }
  0x15   :  { %80 = vmatpush.msra.mxu0 %v48_v3  ;;  %136 = vmatpush.msra.mxu1 %v48_v3 }
  0x16   :  { %123 = vmatmul.msk.f32.vlgmr.msra.gmra.mxu0 %vm52_vm0, %v44_v6  ;;  %124 = vmatmul.msk.f32.vlgmr.msra.gmra.mxu1 %vm52_vm0, %v45_v7 }
  0x93   :  { %v82_v8 = vpop.f32.mrf.mxu0  ;;  %v85_v9 = vpop.f32.mrf.mxu1 }
  0x94   :  { %v94_v10 = vmul.f32 0.25, %v82_v8  ;;  %v95_v11 = vmul.f32 0.25, %v85_v9 }
  0x96   :  { %99 = vst.msk [vmem:[#allocation7] sm:$0xff] %vm98_vm1, %v94_v10 }
  0x97   :  { %100 = vst.msk [vmem:[#allocation7 + $0x8] sm:$0xff] %vm98_vm1, %v95_v11  ;;  %v88_v12 = vpop.f32.mrf.mxu2  ;;  %v91_v13 = vpop.f32.mrf.mxu3 }
  0x98   :  { %v96_v14 = vmul.f32 0.25, %v88_v12  ;;  %v97_v15 = vmul.f32 0.25, %v91_v13 }
  0x9a   :  { %101 = vst.msk [vmem:[#allocation7 + $0x10] sm:$0xff] %vm98_vm1, %v96_v14 }
  0x9b   :  { %102 = vst.msk [vmem:[#allocation7 + $0x18] sm:$0xff] %vm98_vm1, %v97_v15 }
  0x9c   :  { %115 = dma.vmem_to_hbm [thread:$0]  %s108_s1, 512, %s110_s23, [#allocation4], %s223_s17, %s223_s17, %s224_s18  }
  0x9d   :  { %220 = dma.done.wait [#allocation4], 512  }
  0x9e   :  { %221 = vsyncadd [#allocation4], 4294966784 }
  0x9f   :  { %120 = vsyncpa [#allocation3], 1 }
  0xa0   :  { %121 = vsyncpa [#allocation6], 1 }
  0xa1   :  { %122 = vsyncpa [#allocation4], 1 }

</bundles_post_ra>
